<compile_context>
chip_gen: v7x
topology: tpu7x:2x2x1
jax: 0.10.0
libtpu: 0.0.40
codegen_flags: <defaults>
</compile_context>

<pallas_src>
import functools

import jax
import jax.numpy as jnp
from jax import lax
from jax.experimental import pallas as pl
from jax.experimental.pallas import tpu as pltpu


# ----------------------------------------------------------------------------
# Helpers
# ----------------------------------------------------------------------------
def _const_spec(block_shape, index_map):
    """BlockSpec for grid-invariant operands: single-buffered when supported."""
    try:
        return pl.BlockSpec(block_shape, index_map, pipeline_mode=pl.Buffered(1))
    except Exception:                      # older jax without pipeline_mode
        return pl.BlockSpec(block_shape, index_map)


def _physical_vmem_bytes():
    try:
        return int(pltpu.get_tpu_info().vmem_capacity_bytes)
    except Exception:
        return 64 << 20                    # conservative (v7x-sized) fallback


def _vmem_estimate(cc, HW, hw, UU, Cout, x_item, out_item, finalize_in_kernel):
    """VMEM bytes matching the real pipeline allocation (2 bufs only for
    operands whose block index changes; constants counted once)."""
    est = 2 * cc * HW * x_item             # x chunk (double-buffered)
    est += 2 * Cout * cc * 2               # folded conv weight chunk (bf16, x2)
    est += HW * hw * 2                     # pool Kronecker (bf16, Buffered(1))
    if finalize_in_kernel:
        est += hw * UU * 2 + Cout * 4      # upsample Kronecker + BN shift
        est += 2 * Cout * UU * out_item    # output block (changes with batch)
    else:
        est += 2 * Cout * hw * 4           # f32 partial-sum output block
    est += Cout * hw * 4                   # f32 accumulator scratch
    return int(est + (2 << 20))            # headroom for compiler scratch


def _pick_cin_chunk(cin, est_fn, budget, override):
    """Largest Cin chunk fitting the VMEM budget (multiple of 128, or all of
    Cin).  128-multiples keep the (Cout, cc) weight block lane-aligned."""
    if override is not None:
        if not (override == cin or override % 128 == 0):
            raise ValueError("cin_chunk must equal Cin or be a multiple of 128")
        return min(override, cin)
    cands = sorted({c for c in (cin, 2048, 1024, 512, 256, 128) if c <= cin},
                   reverse=True)
    for c in cands:
        if est_fn(c) <= budget:
            return c
    return cands[-1]


# ----------------------------------------------------------------------------
# Resampling matrices (plain JAX, built once per trace).
# ----------------------------------------------------------------------------
def _avg_pool_matrix(in_size: int, d: int) -> jnp.ndarray:
    """P[i, I] = 1/d inside window i; trailing remainder truncated
    (AvgPool2d default: no padding, ceil_mode=False)."""
    out_size = in_size // d
    rows = jnp.arange(out_size)
    cols = jnp.arange(in_size)
    mask = (cols[None, :] // d == rows[:, None]) & (cols[None, :] < out_size * d)
    return mask.astype(jnp.float32) / float(d)


def _bilinear_matrix(out_size: int, in_size: int) -> jnp.ndarray:
    """A (out_size, in_size) for bilinear resize, align_corners=True."""
    if in_size == 1:
        return jnp.ones((out_size, 1), jnp.float32)
    if out_size == 1:
        return jnp.zeros((1, in_size), jnp.float32).at[0, 0].set(1.0)
    scale = (in_size - 1) / (out_size - 1)
    src = jnp.arange(out_size, dtype=jnp.float32) * scale
    i0 = jnp.clip(jnp.floor(src), 0, in_size - 1).astype(jnp.int32)
    i1 = jnp.minimum(i0 + 1, in_size - 1)
    frac = src - i0.astype(jnp.float32)
    oh0 = jax.nn.one_hot(i0, in_size, dtype=jnp.float32)
    oh1 = jax.nn.one_hot(i1, in_size, dtype=jnp.float32)
    return oh0 * (1.0 - frac)[:, None] + oh1 * frac[:, None]


# ----------------------------------------------------------------------------
# Kernels.  Grid = (parallel axis, Cin-chunk reduction axis).
# ----------------------------------------------------------------------------
def _make_main_kernel(cin, cc, n_chunks, needs_mask):
    """Parallel axis = batch; finalize (BN shift + ReLU + upsample) in-kernel."""
    def kernel(x_ref, w_ref, shift_ref, pt_ref, at_ref, o_ref, acc_ref):
        k = pl.program_id(1)

        @pl.when(k == 0)
        def _():
            acc_ref[...] = jnp.zeros_like(acc_ref)

        # x arrives in bf16 from the caller -> astype is a no-op (no HBM pass).
        xb = x_ref[0].astype(jnp.bfloat16)                          # (cc, HW)
        # AvgPool2d as one MXU matmul on the flattened spatial axis.
        pooled = jnp.dot(xb, pt_ref[...],
                         preferred_element_type=jnp.float32)        # (cc, hw)
        if needs_mask:
            # Tail chunk reads past Cin (undefined rows) — zero them on the
            # small pooled tile (rows are independent through the matmul).
            row = lax.broadcasted_iota(jnp.int32, (pooled.shape[0], 1), 0)
            pooled = jnp.where(k * cc + row < cin, pooled, 0.0)
        # 1x1 conv (BN scale folded into w), accumulated over Cin chunks.
        acc_ref[...] += jnp.dot(w_ref[...], pooled.astype(jnp.bfloat16),
                                preferred_element_type=jnp.float32)  # (Cout, hw)

        @pl.when(k == n_chunks - 1)
        def _():
            y = jnp.maximum(acc_ref[...] + shift_ref[...], 0.0)      # BN + ReLU
            out = jnp.dot(y.astype(jnp.bfloat16), at_ref[...],
                          preferred_element_type=jnp.float32)        # (Cout, UU)
            o_ref[0] = out.astype(o_ref.dtype)

    return kernel


def _make_split_kernel(cin, cc, cps, needs_mask):
    """N==1 path: parallel axis = Cin split (gives v7x's 2nd TensorCore work).
    Emits raw partial (Cout, hw) sums; shift/ReLU/upsample happen in a tiny
    plain-JAX epilogue."""
    def kernel(x_ref, w_ref, pt_ref, o_ref, acc_ref):
        s = pl.program_id(0)
        k = pl.program_id(1)

        @pl.when(k == 0)
        def _():
            acc_ref[...] = jnp.zeros_like(acc_ref)

        xb = x_ref[0].astype(jnp.bfloat16)                          # (cc, HW)
        pooled = jnp.dot(xb, pt_ref[...],
                         preferred_element_type=jnp.float32)        # (cc, hw)
        if needs_mask:
            row = lax.broadcasted_iota(jnp.int32, (pooled.shape[0], 1), 0)
            ch0 = (s * cps + k) * cc
            pooled = jnp.where(ch0 + row < cin, pooled, 0.0)
        acc_ref[...] += jnp.dot(w_ref[...], pooled.astype(jnp.bfloat16),
                                preferred_element_type=jnp.float32)

        @pl.when(k == cps - 1)
        def _():
            o_ref[0] = acc_ref[...]

    return kernel


# ----------------------------------------------------------------------------
# Wrapper: NCHW in -> NCHW out (matches the PyTorch module).
#   conv_w : (Cout, Cin)  == PyTorch Conv2d weight (Cout, Cin, 1, 1) squeezed.
#   x should be handed in bf16 for best performance (kernel accepts f32 too).
# ----------------------------------------------------------------------------
@functools.partial(jax.jit,
                   static_argnames=("downsize", "upsize", "cin_chunk", "out_dtype"))
def pspdec_forward(x_nchw, conv_w, bn_gamma, bn_beta, bn_mean, bn_var, *,
                   downsize: int, upsize: int, cin_chunk=None,
                   out_dtype=jnp.bfloat16):
    N, Cin, H, W = x_nchw.shape
    Cout = conv_w.shape[0]
    h, w = H // downsize, W // downsize
    HW, hw, UU = H * W, h * w, upsize * upsize

    # Fold eval-mode BatchNorm: scale -> conv weight, shift stays.
    eps = 1e-5
    scale = bn_gamma / jnp.sqrt(bn_var + eps)                       # (Cout,)
    shift = (bn_beta - bn_mean * scale).astype(jnp.float32).reshape(Cout, 1)
    w_folded = (conv_w.astype(jnp.float32) * scale[:, None]).astype(jnp.bfloat16)

    # Kronecker-product resampling matrices on the flattened spatial axis.
    ph = _avg_pool_matrix(H, downsize)                              # (h, H)
    pw = _avg_pool_matrix(W, downsize)                              # (w, W)
    ah = _bilinear_matrix(upsize, h)                                # (U, h)
    aw = _bilinear_matrix(upsize, w)                                # (U, w)
    pool_t = jnp.kron(ph, pw).T.astype(jnp.bfloat16)                # (HW, hw)
    up_t = jnp.kron(ah, aw).T.astype(jnp.bfloat16)                  # (hw, UU)

    # Free reshape — stays channel-major NCHW, no transpose / no dtype cast
    # (the caller hands bf16 x; casting here would add an HBM pass).
    x_flat = x_nchw.reshape(N, Cin, HW)
    x_item = jnp.dtype(x_flat.dtype).itemsize
    out_item = jnp.dtype(out_dtype).itemsize

    # Chunk size chosen against detected VMEM (full Cin on 128 MiB parts,
    # smaller on v7x's 64 MiB), matching the real pipeline allocation.
    phys_vmem = _physical_vmem_bytes()
    budget = min(int(phys_vmem * 0.6), 100 << 20)
    est_fn = lambda c: _vmem_estimate(c, HW, hw, UU, Cout, x_item, out_item, True)
    cc = _pick_cin_chunk(Cin, est_fn, budget, cin_chunk)
    # N==1: force >=2 chunks so the leading parallel axis can feed both
    # TensorCores on v7x (harmless serial loop on single-TC parts).
    if cin_chunk is None and N == 1 and Cin >= 256 and pl.cdiv(Cin, cc) < 2:
        cc = max(128, pl.cdiv(pl.cdiv(Cin, 2), 128) * 128)
    n_chunks = pl.cdiv(Cin, cc)
    use_split = (N == 1 and n_chunks >= 2)

    if use_split:
        n_split = 2
        cps = pl.cdiv(n_chunks, n_split)
        w_cols = n_split * cps * cc
        needs_mask = (w_cols != Cin)
        if w_cols != Cin:                                 # pad small weight only
            w_folded = jnp.pad(w_folded, ((0, 0), (0, w_cols - Cin)))
        est = _vmem_estimate(cc, HW, hw, UU, Cout, x_item, out_item, False)
        vmem_limit = int(min(max(est, 16 << 20), phys_vmem))

        partials = pl.pallas_call(
            _make_split_kernel(Cin, cc, cps, needs_mask),
            out_shape=jax.ShapeDtypeStruct((n_split, Cout, hw), jnp.float32),
            grid_spec=pltpu.PrefetchScalarGridSpec(
                num_scalar_prefetch=0,
                grid=(n_split, cps),
                in_specs=[
                    # Clamp the chunk index so a padded tail split never issues
                    # a fully out-of-bounds block read (masked to 0 in-kernel).
                    pl.BlockSpec((1, cc, HW),
                                 lambda s, k: (0, jnp.minimum(s * cps + k,
                                                              n_chunks - 1), 0)),
                    pl.BlockSpec((Cout, cc), lambda s, k: (0, s * cps + k)),
                    _const_spec((HW, hw), lambda s, k: (0, 0)),
                ],
                out_specs=pl.BlockSpec((1, Cout, hw), lambda s, k: (s, 0, 0)),
                scratch_shapes=[pltpu.VMEM((Cout, hw), jnp.float32)],
            ),
            compiler_params=pltpu.CompilerParams(
                dimension_semantics=("parallel", "arbitrary"),
                vmem_limit_bytes=vmem_limit),
        )(x_flat, w_folded, pool_t)

        # Tiny epilogue: O(Cout*hw) combine + small upsample matmul (f32).
        y = jnp.maximum(partials.sum(axis=0) + shift, 0.0)           # (Cout, hw)
        out = jnp.einsum('ui,vj,cij->cuv', ah, aw, y.reshape(Cout, h, w))
        return out[None].astype(out_dtype)                           # (1,Cout,U,U)

    # ---- main path: parallel over batch, finalize in-kernel ----
    w_cols = n_chunks * cc
    needs_mask = (w_cols != Cin)
    if w_cols != Cin:
        w_folded = jnp.pad(w_folded, ((0, 0), (0, w_cols - Cin)))
    est = _vmem_estimate(cc, HW, hw, UU, Cout, x_item, out_item, True)
    vmem_limit = int(min(max(est, 16 << 20), phys_vmem))

    out_flat = pl.pallas_call(
        _make_main_kernel(Cin, cc, n_chunks, needs_mask),
        out_shape=jax.ShapeDtypeStruct((N, Cout, UU), out_dtype),
        grid_spec=pltpu.PrefetchScalarGridSpec(
            num_scalar_prefetch=0,
            grid=(N, n_chunks),
            in_specs=[
                pl.BlockSpec((1, cc, HW), lambda n, k: (n, k, 0)),   # x chunk
                pl.BlockSpec((Cout, cc), lambda n, k: (0, k)),       # W' chunk
                _const_spec((Cout, 1), lambda n, k: (0, 0)),         # BN shift
                _const_spec((HW, hw), lambda n, k: (0, 0)),          # pool kron^T
                _const_spec((hw, UU), lambda n, k: (0, 0)),          # upsample kron^T
            ],
            out_specs=pl.BlockSpec((1, Cout, UU), lambda n, k: (n, 0, 0)),
            scratch_shapes=[pltpu.VMEM((Cout, hw), jnp.float32)],    # f32 conv acc
        ),
        compiler_params=pltpu.CompilerParams(
            dimension_semantics=("parallel", "arbitrary"),
            vmem_limit_bytes=vmem_limit),
    )(x_flat, w_folded, shift, pool_t, up_t)

    return out_flat.reshape(N, Cout, upsize, upsize)


# ----------------------------------------------------------------------------
# Pure-JAX f32 reference (loose correctness check for the bf16 kernel).
# ----------------------------------------------------------------------------
def _pspdec_reference(x, conv_w, gamma, beta, mean, var, downsize, upsize):
    N, Cin, H, W = x.shape
    h, w = H // downsize, W // downsize
    xp = x[:, :, :h * downsize, :w * downsize].reshape(
        N, Cin, h, downsize, w, downsize).mean(axis=(3, 5))
    y = jnp.einsum('oc,nchw->nohw', conv_w, xp)
    scale = gamma / jnp.sqrt(var + 1e-5)
    shift = beta - mean * scale
    y = jnp.maximum(y * scale[None, :, None, None] + shift[None, :, None, None], 0.0)
    ah = _bilinear_matrix(upsize, h)
    aw = _bilinear_matrix(upsize, w)
    return jnp.einsum('ui,vj,noij->nouv', ah, aw, y)


# ----------------------------------------------------------------------------
# Deterministic parameter init + smoke tests.
# ----------------------------------------------------------------------------
def _run_case(name, N, Cin, Cout, H, W, downsize, upsize, cin_chunk=None):
    key = jax.random.PRNGKey(0)
    k_x, k_w, k_g, k_b, k_m, k_v = jax.random.split(key, 6)

    # bf16 activations end-to-end (halves HBM read traffic vs f32).
    x = jax.random.normal(k_x, (N, Cin, H, W), dtype=jnp.float32)
    x = x.astype(jnp.bfloat16)

    conv_w = 0.1 * jax.random.normal(k_w, (Cout, Cin), dtype=jnp.float32)
    bn_gamma = jax.random.uniform(k_g, (Cout,), jnp.float32, 0.5, 1.5)
    bn_beta = 0.1 * jax.random.normal(k_b, (Cout,), dtype=jnp.float32)
    bn_mean = 0.1 * jax.random.normal(k_m, (Cout,), dtype=jnp.float32)
    bn_var = jax.random.uniform(k_v, (Cout,), jnp.float32, 0.5, 1.5)

    out = pspdec_forward(x, conv_w, bn_gamma, bn_beta, bn_mean, bn_var,
                         downsize=downsize, upsize=upsize, cin_chunk=cin_chunk)
    out = jax.block_until_ready(out)

    ref = _pspdec_reference(x.astype(jnp.float32), conv_w, bn_gamma, bn_beta,
                            bn_mean, bn_var, downsize, upsize)

    assert out.shape == (N, Cout, upsize, upsize), (name, out.shape)
    out_f = out.astype(jnp.float32)
    assert bool(jnp.all(jnp.isfinite(out_f))), name
    assert bool(jnp.all(out_f >= -1e-6)), name           # post-ReLU, non-negative
    err = float(jnp.max(jnp.abs(out_f - ref)))
    tol = 5e-2 * max(1.0, float(jnp.max(jnp.abs(ref))))
    assert err <= tol, f"{name}: max abs err {err} > tol {tol}"


if __name__ == "__main__":
    # Main path: single Cin chunk, BN/ReLU/upsample finalized in-kernel.
    _run_case("base", N=2, Cin=4, Cout=8, H=16, W=16, downsize=4, upsize=8)
    # Chunked Cin reduction with zero-padded weights + in-kernel tail mask.
    _run_case("chunked", N=2, Cin=200, Cout=16, H=8, W=8, downsize=2, upsize=8,
              cin_chunk=128)
    # N==1: Cin split across a leading parallel axis (second TC on v7x).
    _run_case("split", N=1, Cin=200, Cout=16, H=8, W=8, downsize=2, upsize=8,
              cin_chunk=128)
    print("KERNEL_OK")
</pallas_src>

<mosaic_0001>
module attributes {stable_mosaic.version = 11 : i64} {
  func.func @kernel(%arg0: i32, %arg1: i32, %arg2: memref<1x4x256xbf16, #tpu.memory_space<vmem>>, %arg3: memref<8x4xbf16, #tpu.memory_space<vmem>>, %arg4: memref<8x1xf32, #tpu.memory_space<vmem>>, %arg5: memref<256x16xbf16, #tpu.memory_space<vmem>>, %arg6: memref<16x64xbf16, #tpu.memory_space<vmem>>, %arg7: memref<1x8x64xbf16, #tpu.memory_space<vmem>>, %arg8: memref<8x16xf32, #tpu.memory_space<vmem>>) attributes {dimension_semantics = [#tpu.dimension_semantics<parallel>, #tpu.dimension_semantics<arbitrary>], iteration_bounds = array<i64: 2, 1>, scalar_prefetch = 0 : i64, scratch_operands = 1 : i64, tpu.core_type = #tpu.core_type<tc>, window_params = [{transform_indices = @transform_0, window_bounds = array<i64: 1, 4, 256>}, {transform_indices = @transform_1, window_bounds = array<i64: 8, 4>}, {pipeline_mode = #tpu.pipeline_mode<synchronous>, transform_indices = @transform_2, window_bounds = array<i64: 8, 1>}, {pipeline_mode = #tpu.pipeline_mode<synchronous>, transform_indices = @transform_3, window_bounds = array<i64: 256, 16>}, {pipeline_mode = #tpu.pipeline_mode<synchronous>, transform_indices = @transform_4, window_bounds = array<i64: 16, 64>}, {transform_indices = @transform_5, window_bounds = array<i64: 1, 8, 64>}]} {
    %c0_i32 = arith.constant 0 : i32
    %0 = arith.cmpi eq, %arg1, %c0_i32 : i32
    %1 = arith.extui %0 : i1 to i32
    %c0_i32_0 = arith.constant 0 : i32
    %2 = arith.cmpi ne, %1, %c0_i32_0 : i32
    scf.if %2 {
      %cst_14 = arith.constant 0.000000e+00 : f32
      %16 = vector.broadcast %cst_14 : f32 to vector<8x16xf32>
      %c0_15 = arith.constant 0 : index
      %c0_16 = arith.constant 0 : index
      %17 = vector.load %arg8[%c0_15, %c0_16] : memref<8x16xf32, #tpu.memory_space<vmem>>, vector<8x16xf32>
      tpu.vector_store %arg8[%c0_15, %c0_16], %16 {strides = array<i32>} : memref<8x16xf32, #tpu.memory_space<vmem>>, vector<8x16xf32>,
    } else {
    }
    %c0 = arith.constant 0 : index
    %c0_1 = arith.constant 0 : index
    %c0_2 = arith.constant 0 : index
    %3 = vector.load %arg2[%c0, %c0_1, %c0_2] : memref<1x4x256xbf16, #tpu.memory_space<vmem>>, vector<1x4x256xbf16>
    %4 = vector.shape_cast %3 : vector<1x4x256xbf16> to vector<4x256xbf16>
    %c0_3 = arith.constant 0 : index
    %c0_4 = arith.constant 0 : index
    %5 = vector.load %arg5[%c0_3, %c0_4] : memref<256x16xbf16, #tpu.memory_space<vmem>>, vector<256x16xbf16>
    %cst = arith.constant dense<0.000000e+00> : vector<4x16xf32>
    %6 = tpu.matmul %4, %5, %cst {dimension_numbers = #tpu.dot_dimension_numbers<[1], [0], [0], [1], [0, 0, 1, 1], [], []>} : vector<4x256xbf16>, vector<256x16xbf16>, vector<4x16xf32> -> vector<4x16xf32>
    %c0_5 = arith.constant 0 : index
    %c0_6 = arith.constant 0 : index
    %7 = vector.load %arg8[%c0_5, %c0_6] : memref<8x16xf32, #tpu.memory_space<vmem>>, vector<8x16xf32>
    %c0_7 = arith.constant 0 : index
    %c0_8 = arith.constant 0 : index
    %8 = vector.load %arg3[%c0_7, %c0_8] : memref<8x4xbf16, #tpu.memory_space<vmem>>, vector<8x4xbf16>
    %9 = arith.truncf %6 : vector<4x16xf32> to vector<4x16xbf16>
    %cst_9 = arith.constant dense<0.000000e+00> : vector<8x16xf32>
    %10 = tpu.matmul %8, %9, %cst_9 {dimension_numbers = #tpu.dot_dimension_numbers<[1], [0], [0], [1], [0, 0, 1, 1], [], []>} : vector<8x4xbf16>, vector<4x16xbf16>, vector<8x16xf32> -> vector<8x16xf32>
    %11 = arith.addf %7, %10 : vector<8x16xf32>
    %c0_10 = arith.constant 0 : index
    %c0_11 = arith.constant 0 : index
    %12 = vector.load %arg8[%c0_10, %c0_11] : memref<8x16xf32, #tpu.memory_space<vmem>>, vector<8x16xf32>
    tpu.vector_store %arg8[%c0_10, %c0_11], %11 {strides = array<i32>} : memref<8x16xf32, #tpu.memory_space<vmem>>, vector<8x16xf32>,
    %c0_i32_12 = arith.constant 0 : i32
    %13 = arith.cmpi eq, %arg1, %c0_i32_12 : i32
    %14 = arith.extui %13 : i1 to i32
    %c0_i32_13 = arith.constant 0 : i32
    %15 = arith.cmpi ne, %14, %c0_i32_13 : i32
    scf.if %15 {
      %c0_14 = arith.constant 0 : index
      %c0_15 = arith.constant 0 : index
      %16 = vector.load %arg8[%c0_14, %c0_15] : memref<8x16xf32, #tpu.memory_space<vmem>>, vector<8x16xf32>
      %c0_16 = arith.constant 0 : index
      %c0_17 = arith.constant 0 : index
      %17 = vector.load %arg4[%c0_16, %c0_17] : memref<8x1xf32, #tpu.memory_space<vmem>>, vector<8x1xf32>
      %18 = vector.broadcast %17 : vector<8x1xf32> to vector<8x16xf32>
      %19 = arith.addf %16, %18 : vector<8x16xf32>
      %cst_18 = arith.constant 0.000000e+00 : f32
      %20 = vector.broadcast %cst_18 : f32 to vector<8x16xf32>
      %21 = arith.maximumf %19, %20 : vector<8x16xf32>
      %22 = arith.truncf %21 : vector<8x16xf32> to vector<8x16xbf16>
      %c0_19 = arith.constant 0 : index
      %c0_20 = arith.constant 0 : index
      %23 = vector.load %arg6[%c0_19, %c0_20] : memref<16x64xbf16, #tpu.memory_space<vmem>>, vector<16x64xbf16>
      %cst_21 = arith.constant dense<0.000000e+00> : vector<8x64xf32>
      %24 = tpu.matmul %22, %23, %cst_21 {dimension_numbers = #tpu.dot_dimension_numbers<[1], [0], [0], [1], [0, 0, 1, 1], [], []>} : vector<8x16xbf16>, vector<16x64xbf16>, vector<8x64xf32> -> vector<8x64xf32>
      %25 = arith.truncf %24 : vector<8x64xf32> to vector<8x64xbf16>
      %c0_22 = arith.constant 0 : index
      %c0_23 = arith.constant 0 : index
      %c0_24 = arith.constant 0 : index
      %26 = vector.load %arg7[%c0_22, %c0_23, %c0_24] : memref<1x8x64xbf16, #tpu.memory_space<vmem>>, vector<1x8x64xbf16>
      %27 = vector.shape_cast %26 : vector<1x8x64xbf16> to vector<8x64xbf16>
      %28 = vector.shape_cast %25 : vector<8x64xbf16> to vector<1x8x64xbf16>
      tpu.vector_store %arg7[%c0_22, %c0_23, %c0_24], %28 {strides = array<i32>} : memref<1x8x64xbf16, #tpu.memory_space<vmem>>, vector<1x8x64xbf16>,
    } else {
    }
    return
  }
  func.func @transform_0(%arg0: i32, %arg1: i32) -> (i32, i32, i32) {
    %c0_i32 = arith.constant 0 : i32
    %c0_i32_0 = arith.constant 0 : i32
    return %arg0, %arg1, %c0_i32 : i32, i32, i32
  }
  func.func @transform_1(%arg0: i32, %arg1: i32) -> (i32, i32) {
    %c0_i32 = arith.constant 0 : i32
    %c0_i32_0 = arith.constant 0 : i32
    return %c0_i32, %arg1 : i32, i32
  }
  func.func @transform_2(%arg0: i32, %arg1: i32) -> (i32, i32) {
    %c0_i32 = arith.constant 0 : i32
    %c0_i32_0 = arith.constant 0 : i32
    %c0_i32_1 = arith.constant 0 : i32
    return %c0_i32, %c0_i32_0 : i32, i32
  }
  func.func @transform_3(%arg0: i32, %arg1: i32) -> (i32, i32) {
    %c0_i32 = arith.constant 0 : i32
    %c0_i32_0 = arith.constant 0 : i32
    %c0_i32_1 = arith.constant 0 : i32
    return %c0_i32, %c0_i32_0 : i32, i32
  }
  func.func @transform_4(%arg0: i32, %arg1: i32) -> (i32, i32) {
    %c0_i32 = arith.constant 0 : i32
    %c0_i32_0 = arith.constant 0 : i32
    %c0_i32_1 = arith.constant 0 : i32
    return %c0_i32, %c0_i32_0 : i32, i32
  }
  func.func @transform_5(%arg0: i32, %arg1: i32) -> (i32, i32, i32) {
    %c0_i32 = arith.constant 0 : i32
    %c0_i32_0 = arith.constant 0 : i32
    %c0_i32_1 = arith.constant 0 : i32
    return %arg0, %c0_i32, %c0_i32_0 : i32, i32, i32
  }
}

</mosaic_0001>

<bundles_post_ra>
// kernel: pspdec_forward.1
= control target key start
LH: loop header
LB: loop body
LE: loop exit
PB: predicated region body
PF: predicated region fallthrough
CT: control target
= control target key end

     0   :  { %s832_s18 = smov 0   ;;  %s834_s19 = smov 0   ;;  %s934_s0 = inlined_call_operand.vmem [shape: bf16[2,4,256], index: 0, kind: input, shape index: {}]   ;;  %s935_s1 = inlined_call_operand.vmem [shape: bf16[8,4], index: 1, kind: input, shape index: {}]   ;;  %s936_s2 = inlined_call_operand.vmem [shape: f32[8,1], index: 2, kind: input, shape index: {}]   ;;  %s937_s3 = inlined_call_operand.vmem [shape: bf16[256,16], index: 3, kind: input, shape index: {}]   ;;  %s938_s4 = inlined_call_operand.vmem [shape: bf16[16,64], index: 4, kind: input, shape index: {}]   ;;  %s939_s5 = inlined_call_operand.vmem [shape: bf16[2,8,64], index: 5, kind: output, shape index: {}]  }
   0x1   :  { %s836_s20 = smov 0  }
   0x2 LB: > { %s27_s21 = sadd.s32 1, %s793_s19  ;;  %p665_p0 = scmp.ge.s32.totalorder %s797_s20, 1  ;;  %s797_s20 = sphi %s836_s20, %s15_s20   ;;  %s793_s19 = sphi %s834_s19, %s941_s19   ;;  %s789_s18 = sphi %s832_s18, %s940_s18  }
   0x3   : > { %p29_p1 = scmp.ge.s32.totalorder %s27_s21, 2  ;;  %p214_p2 = scmp.lt.s32.totalorder %s797_s20, 3 }
   0x5   : > { %s943_s21 = smov (%p29_p1, %s27_s21), 0  ;;  %p215_p3 = pnand %p665_p0, %p214_p2 }
   0x6   : > { %v758_v0 = vld [vmem:[%s937_s3 + $0x40] sm:$0xff] (!%p215_p3)   ;;  %v760_v2 = vld [vmem:[%s937_s3 + $0x48] sm:$0xff] (!%p215_p3)   ;;  %p249_p4 = scmp.lt.s32.totalorder (!%p215_p3), %s789_s18, 1  ;;  %v762_v4 = vld [vmem:[%s937_s3 + $0x50] sm:$0xff] (!%p215_p3)   ;;  %v799_v18 = vmov (!%p215_p3), 0.0   ;;  %vm800_vm0 = vmmov (!%p215_p3), 0  }
   0x7   : > { %218 = sbr.rel (%p215_p3) target bundleno = 703 (0x2bf), region = 40  ;;  %v759_v1 = vld [vmem:[%s937_s3] sm:$0xff] (!%p215_p3)   ;;  %692 = vmatprep.subr.bf16.mxu0 (!%p215_p3), %v758_v0  ;;  %v761_v3 = vld [vmem:[%s937_s3 + $0x8] sm:$0xff] (!%p215_p3)   ;;  %v763_v5 = vld [vmem:[%s937_s3 + $0x10] sm:$0xff] (!%p215_p3)   ;;  %718 = vmatprep.subr.bf16.mxu1 (!%p215_p3), %v799_v18  ;;  %vm271_vm1 = vcmask (!%p215_p3), 130048   ;;  %v801_v20 = vmov (!%p215_p3), 0  }
   0x8   : > { %693 = vmatpush3.bf16.msra.mxu0 (!%p215_p3), %v759_v1  ;;  %v764_v6 = vld [vmem:[%s937_s3 + $0x58] sm:$0xff] (!%p215_p3)   ;;  %v766_v8 = vld [vmem:[%s937_s3 + $0x60] sm:$0xff] (!%p215_p3)   ;;  %v768_v10 = vld [vmem:[%s937_s3 + $0x68] sm:$0xff] (!%p215_p3)   ;;  %720 = vmatprep.mubr.msk.bf16.mxu1 (!%p215_p3), %vm800_vm0, %v799_v18  ;;  %272 = vst.msk [vmem:[#allocation2] sm:$0xff] (!%p215_p3), %vm271_vm1, %v799_v18  ;;  %vm460_vm2 = vcmask (!%p215_p3), 1041408   ;;  %vm456_vm3 = vcmask (!%p215_p3), 31744  }
   0x9   : > { %694 = vmatprep.subr.bf16.mxu0 (!%p215_p3), %v760_v2  ;;  %v765_v7 = vld [vmem:[%s937_s3 + $0x18] sm:$0xff] (!%p215_p3)   ;;  %v767_v9 = vld [vmem:[%s937_s3 + $0x20] sm:$0xff] (!%p215_p3)   ;;  %v769_v13 = vld [vmem:[%s937_s3 + $0x28] sm:$0xff] (!%p215_p3)   ;;  %757 = vset.pattern.permute.xlu0 (!%p215_p3), %v801_v20  ;;  %vm572_vm4 = vcmask (!%p215_p3), 519168  }
   0xa   : > { %v770_v14 = vld [vmem:[%s937_s3 + $0x70] sm:$0xff] (!%p215_p3)   ;;  %v772_v16 = vld [vmem:[%s937_s3 + $0x78] sm:$0xff] (!%p215_p3)   ;;  %v511_v19 = vld [vmem:[%s936_s2] sm:$0xff] (!%p215_p3) }
   0xb   : > { %v771_v15 = vld [vmem:[%s937_s3 + $0x30] sm:$0xff] (!%p215_p3)   ;;  %v773_v17 = vld [vmem:[%s937_s3 + $0x38] sm:$0xff] (!%p215_p3)   ;;  %514 = vperm.xlu0 (!%p215_p3), %757, %v511_v19   ;;  %v454_v28 = vld [vmem:[%s935_s1] sm:$0xf] (!%p215_p3) }
   0xc   : > { %695 = vmatpush3.bf16.msra.mxu0 (!%p215_p3), %v761_v3  ;;  %v774_v29 = vld [vmem:[%s938_s4] sm:$0xff] (!%p215_p3)  }
   0xd   : > { %696 = vmatprep.subr.bf16.mxu0 (!%p215_p3), %v762_v4 }
   0xe   : > { %s945_s18 = smov (!%p249_p4, %s789_s18), 1 }
   0xf   : > { %s691_s11 = sshll.u32 %s945_s18, 2  ;;  %v453_v30 = vld [vmem:[#allocation2] sm:$0xff] }
  0x10   : > { %697 = vmatpush3.bf16.msra.mxu0 %v763_v5  ;;  %s257_s22 = scalar_lea.vmem %s934_s0, %s691_s11  ;;  %s265_s25 = scalar_lea.vmem %s939_s5, %s691_s11 }
  0x11   : > { %698 = vmatprep.subr.bf16.mxu0 %v764_v6  ;;  %v669_v11 = vld.sshfl [vmem:[%s257_s22] sm:$0x33 pattern:$0x76325410] }
  0x12   : > { %v314_v12 = vcombine.high %v669_v11, %v669_v11 }
  0x14   : > { %699 = vmatpush3.bf16.msra.mxu0 %v765_v7  ;;  %445 = vmatprep.mubr.bf16.mxu0 %v314_v12 }
  0x15   : > { %700 = vmatprep.subr.bf16.mxu0 %v766_v8 }
  0x18   : > { %701 = vmatpush3.bf16.msra.mxu0 %v767_v9 }
  0x19   : > { %702 = vmatprep.subr.bf16.mxu0 %v768_v10 }
  0x1c   : > { %703 = vmatpush3.bf16.msra.mxu0 %v769_v13 }
  0x1d   : > { %704 = vmatprep.subr.bf16.mxu0 %v770_v14 }
  0x20   : > { %705 = vmatpush3.bf16.msra.mxu0 %v771_v15 }
  0x21   : > { %706 = vmatprep.subr.bf16.mxu0 %v772_v16 }
  0x24   : > { %707 = vmatpush3.bf16.msra.mxu0 %v773_v17 }
  0x27   : > { %446 = vmatmul.mubr.bf16.vlgmr.msra.gmra.mrb[0].mxu0 %v669_v11 }
  0x8a   : > { %v515_v36 = vpop.permute.xlu0 %514 }
  0xfa   : > { %v708_v21 = vpop.f32.mrb[0].mxu0 }
  0xfb   : > { %v709_v22 = vpop.f32.mrb[1].mxu0 }
  0xfc   : > { %v710_v23 = vadd.f32 %v709_v22, %v708_v21  ;;  %v711_v24 = vpop.f32.mrb[2].mxu0 }
  0xfd   : > { %v712_v25 = vpop.f32.mrb[3].mxu0 }
  0xfe   : > { %v455_v26 = vpack.c.bf16 %v710_v23, %v710_v23 }
 0x100   : > { %v462_v27 = vsel %vm460_vm2, %v455_v26, 0 }
 0x101   : > { %719 = vmatpush3.bf16.msra.mxu1 %v462_v27 }
 0x102   : > { %724 = vmatprep.subr.bf16.mxu1 %v799_v18 }
 0x104   : > { %721 = vmatmul.mubr.msk.bf16.vlgmr.msra.gmra.mrb[0].mxu1 %vm456_vm3, %v454_v28 }
 0x105   : > { %726 = vmatprep.mubr.msk.bf16.mxu1 %vm800_vm0, %v799_v18  ;;  %725 = vmatpush3.bf16.msra.mxu1 %v774_v29 }
 0x1d7   : > { %v498_v31 = vpop.f32.mrb[0].mxu1 }
 0x1d8   : > { %v504_v32 = vadd.f32 %v498_v31, %v453_v30  ;;  %v722_v33 = vpop.f32.mrb[1].mxu1 }
 0x1d9   : > { %v501_v34 = vpop.f32.mrb[2].mxu1 }
 0x1da   : > { %506 = vst.msk [vmem:[#allocation2] sm:$0xff] %vm271_vm1, %v504_v32  ;;  %v723_v35 = vpop.f32.mrb[3].mxu1 }
 0x1e1   : > { %v510_v37 = vld [vmem:[#allocation2] sm:$0xff] }
 0x1e2   : > { %v517_v38 = vadd.f32 %v515_v36, %v510_v37 }
 0x1e4   : > { %v518_v39 = vmax.f32 %v517_v38, 0.0 }
 0x1e6   : > { %v519_v40 = vpack.c.bf16 %v518_v39, %v518_v39 }
 0x1e8   : > { %727 = vmatmul.mubr.msk.bf16.vlgmr.msra.gmra.mrb[4].mxu1 %vm271_vm1, %v519_v40 }
 0x2bb   : > { %v565_v41 = vpop.f32.mrb[4].mxu1 }
 0x2bc   : > { %v571_v42 = vpack.c.bf16 %v565_v41, %v565_v41  ;;  %v728_v43 = vpop.f32.mrb[5].mxu1 }
 0x2bd   : > { %v568_v44 = vpop.f32.mrb[6].mxu1 }
 0x2be   : > { %573 = vst.msk [vmem:[%s265_s25] sm:$0xf] %vm572_vm4, %v571_v42  ;;  %v729_v45 = vpop.f32.mrb[7].mxu1 }
 0x2bf PF: > { %s15_s20 = sadd.s32 1, %s797_s20   ;;  %s940_s18 = smov %s793_s19 }
 0x2c0   : > { %p12_p5 = scmp.ge.s32.totalorder %s15_s20, 4   ;;  %s941_s19 = smov %s943_s21 }
 0x2c2   :  { %14 = sbr.rel (!%p12_p5) target bundleno = 2 (0x2), region = 81 }

</bundles_post_ra>
